<compile_context>
chip_gen: v6e
topology: v6e:2x2x1
jax: 0.10.0
libtpu: 0.0.40
codegen_flags: <defaults>
</compile_context>

<pallas_src>
import functools

import jax
import jax.numpy as jnp
from jax import lax
from jax.experimental import pallas as pl
from jax.experimental.pallas import tpu as pltpu


def _make_kernel(compute_dtype):
    def kernel(xq_ref, xkv_ref, o_ref):
        # xq_ref: (TQ, Dp)   query tile
        # xkv_ref: (S, Dp)   full sequence (keys == values == x)
        # o_ref:  (TQ, Dp)
        xq = xq_ref[...]
        xkv = xkv_ref[...]

        # Fold the 0.02 scale into the small (TQ, D) operand (S*D VPU ops
        # instead of S*S), then contract over D directly on the MXU without
        # materializing an explicit transpose of the (S, D) tile.
        q = (xq * jnp.asarray(0.02, xq.dtype)).astype(compute_dtype)
        k = xkv.astype(compute_dtype)
        scores = lax.dot_general(
            q, k,
            dimension_numbers=(((1,), (1,)), ((), ())),
            preferred_element_type=jnp.float32,
        )  # (TQ, S), f32

        # Numerically stable softmax statistics in f32.
        m = jnp.max(scores, axis=-1, keepdims=True)
        e = jnp.exp(scores - m)
        denom = jnp.sum(e, axis=-1, keepdims=True)

        # TODO(synk): torch.nn.Dropout(0.02) is identity in eval mode; training-mode
        # dropout (random mask + 1/(1-p) scaling) is intentionally not applied.

        # Second matmul on the UNnormalized weights; normalization is deferred
        # to the (TQ, D) output (S*D multiplies instead of S*S) and the
        # reciprocal goes to the otherwise-idle EUP slot.
        out_un = jnp.dot(
            e.astype(compute_dtype), xkv.astype(compute_dtype),
            preferred_element_type=jnp.float32,
        )  # (TQ, Dp), f32
        o_ref[...] = (out_un * pl.reciprocal(denom, approx=True)).astype(o_ref.dtype)

    return kernel


def _pick_tq(S):
    # Cap TQ so the per-step f32 (TQ, S) score + exp intermediates stay well
    # under v7x's 64 MiB VMEM (leave headroom for the double-buffered
    # (TQ, Dp) / (S, Dp) I/O blocks).  ~8 MiB budget per (TQ, S) f32 tile.
    budget_elems = (8 * 1024 * 1024) // 4
    for tq in (512, 256, 128, 64, 32, 16, 8):
        if S % tq == 0 and tq * S <= budget_elems:
            return tq
    return S  # tiny / odd sequence lengths: a single full-extent tile


@functools.partial(jax.jit, static_argnames=("compute_dtype",))
def attn_like(x, compute_dtype=jnp.float32):
    """x: (B, S, D) float32 -> (B, S, D) float32.

    compute_dtype=jnp.bfloat16 runs both matmuls on bf16 operands with f32
    accumulation (~2x MXU throughput on v6e/v7x) at the cost of looser
    numerical agreement; default keeps the module's f32 semantics.
    """
    B, S, D = x.shape

    # Lane-dense output: pad the hidden dim to a multiple of 128.  Zero
    # padding is exact (padded columns contribute 0 to x @ x^T and produce
    # zero output columns which are sliced off).
    Dp = D if D % 128 == 0 else ((D + 127) // 128) * 128
    xp = x if Dp == D else jnp.pad(x, ((0, 0), (0, 0), (0, Dp - D)))

    TQ = _pick_tq(S)
    grid = (B, S // TQ)

    out = pl.pallas_call(
        _make_kernel(compute_dtype),
        out_shape=jax.ShapeDtypeStruct((B, S, Dp), x.dtype),
        grid_spec=pltpu.PrefetchScalarGridSpec(
            num_scalar_prefetch=0,
            grid=grid,
            in_specs=[
                # query tile: (TQ, Dp) slice of x
                pl.BlockSpec((pl.Squeezed(), TQ, Dp), lambda b, q: (b, q, 0)),
                # full-sequence "kv" view of the same x (index_map ignores q)
                pl.BlockSpec((pl.Squeezed(), S, Dp), lambda b, q: (b, 0, 0)),
            ],
            out_specs=pl.BlockSpec((pl.Squeezed(), TQ, Dp), lambda b, q: (b, q, 0)),
        ),
        compiler_params=pltpu.CompilerParams(
            dimension_semantics=("parallel", "parallel"),
            vmem_limit_bytes=64 * 1024 * 1024,
        ),
    )(xp, xp)

    return out if Dp == D else out[..., :D]


def _reference(x):
    scores = jnp.einsum("bsd,btd->bst", x, x) * 0.02
    probs = jax.nn.softmax(scores, axis=-1)
    return jnp.einsum("bst,btd->bsd", probs, x)


if __name__ == "__main__":
    key = jax.random.PRNGKey(0)
    B, S, D = 2, 8, 32
    x = jax.random.normal(key, (B, S, D), dtype=jnp.float32)

    out = attn_like(x)
    jax.block_until_ready(out)

    ref = _reference(x)
    assert out.shape == (B, S, D)
    # Tolerance accounts for the EUP approximate reciprocal in the softmax
    # normalization; matmuls/accumulation are full f32.
    assert jnp.allclose(out, ref, atol=5e-3, rtol=5e-3), float(
        jnp.max(jnp.abs(out - ref))
    )
    print("KERNEL_OK")
</pallas_src>

<mosaic_0001>
module attributes {stable_mosaic.version = 11 : i64} {
  func.func @kernel(%arg0: i32, %arg1: i32, %arg2: memref<1x8x128xf32, #tpu.memory_space<vmem>>, %arg3: memref<1x8x128xf32, #tpu.memory_space<vmem>>, %arg4: memref<1x8x128xf32, #tpu.memory_space<vmem>>) attributes {dimension_semantics = [#tpu.dimension_semantics<parallel>, #tpu.dimension_semantics<parallel>], iteration_bounds = array<i64: 2, 1>, scalar_prefetch = 0 : i64, scratch_operands = 0 : i64, tpu.core_type = #tpu.core_type<tc>, window_params = [{transform_indices = @transform_0, window_bounds = array<i64: 1, 8, 128>}, {transform_indices = @transform_1, window_bounds = array<i64: 1, 8, 128>}, {transform_indices = @transform_2, window_bounds = array<i64: 1, 8, 128>}]} {
    %c0 = arith.constant 0 : index
    %c0_0 = arith.constant 0 : index
    %c0_1 = arith.constant 0 : index
    %0 = vector.load %arg2[%c0, %c0_0, %c0_1] : memref<1x8x128xf32, #tpu.memory_space<vmem>>, vector<1x8x128xf32>
    %1 = vector.shape_cast %0 : vector<1x8x128xf32> to vector<8x128xf32>
    %c0_2 = arith.constant 0 : index
    %c0_3 = arith.constant 0 : index
    %c0_4 = arith.constant 0 : index
    %2 = vector.load %arg3[%c0_2, %c0_3, %c0_4] : memref<1x8x128xf32, #tpu.memory_space<vmem>>, vector<1x8x128xf32>
    %3 = vector.shape_cast %2 : vector<1x8x128xf32> to vector<8x128xf32>
    %cst = arith.constant 2.000000e-02 : f32
    %4 = vector.broadcast %cst : f32 to vector<8x128xf32>
    %5 = arith.mulf %1, %4 : vector<8x128xf32>
    %cst_5 = arith.constant dense<0.000000e+00> : vector<8x8xf32>
    %6 = tpu.matmul %5, %3, %cst_5 {dimension_numbers = #tpu.dot_dimension_numbers<[1], [1], [0], [0], [0, 0, 1, 0], [], []>} : vector<8x128xf32>, vector<8x128xf32>, vector<8x8xf32> -> vector<8x8xf32>
    %cst_6 = arith.constant dense<0xFF800000> : vector<8xf32>
    %7 = vector.multi_reduction <maximumf>, %6, %cst_6 [1] : vector<8x8xf32> to vector<8xf32>
    %8 = vector.shape_cast %7 : vector<8xf32> to vector<8x1xf32>
    %9 = vector.broadcast %8 : vector<8x1xf32> to vector<8x8xf32>
    %10 = arith.subf %6, %9 : vector<8x8xf32>
    %11 = math.exp %10 : vector<8x8xf32>
    %cst_7 = arith.constant dense<0.000000e+00> : vector<8xf32>
    %12 = vector.multi_reduction <add>, %11, %cst_7 [1] : vector<8x8xf32> to vector<8xf32>
    %13 = vector.shape_cast %12 : vector<8xf32> to vector<8x1xf32>
    %cst_8 = arith.constant dense<0.000000e+00> : vector<8x128xf32>
    %14 = tpu.matmul %11, %3, %cst_8 {dimension_numbers = #tpu.dot_dimension_numbers<[1], [0], [0], [1], [0, 0, 1, 1], [], []>} : vector<8x8xf32>, vector<8x128xf32>, vector<8x128xf32> -> vector<8x128xf32>
    %15 = tpu.reciprocal %13 {approx = true} : vector<8x1xf32> -> vector<8x1xf32>
    %16 = vector.broadcast %15 : vector<8x1xf32> to vector<8x128xf32>
    %17 = arith.mulf %14, %16 : vector<8x128xf32>
    %c0_9 = arith.constant 0 : index
    %c0_10 = arith.constant 0 : index
    %c0_11 = arith.constant 0 : index
    %18 = vector.load %arg4[%c0_9, %c0_10, %c0_11] : memref<1x8x128xf32, #tpu.memory_space<vmem>>, vector<1x8x128xf32>
    %19 = vector.shape_cast %18 : vector<1x8x128xf32> to vector<8x128xf32>
    %20 = vector.shape_cast %17 : vector<8x128xf32> to vector<1x8x128xf32>
    tpu.vector_store %arg4[%c0_9, %c0_10, %c0_11], %20 {strides = array<i32>} : memref<1x8x128xf32, #tpu.memory_space<vmem>>, vector<1x8x128xf32>,
    return
  }
  func.func @transform_0(%arg0: i32, %arg1: i32) -> (i32, i32, i32) {
    %c0_i32 = arith.constant 0 : i32
    %c0_i32_0 = arith.constant 0 : i32
    return %arg0, %arg1, %c0_i32 : i32, i32, i32
  }
  func.func @transform_1(%arg0: i32, %arg1: i32) -> (i32, i32, i32) {
    %c0_i32 = arith.constant 0 : i32
    %c0_i32_0 = arith.constant 0 : i32
    %c0_i32_1 = arith.constant 0 : i32
    return %arg0, %c0_i32, %c0_i32_0 : i32, i32, i32
  }
  func.func @transform_2(%arg0: i32, %arg1: i32) -> (i32, i32, i32) {
    %c0_i32 = arith.constant 0 : i32
    %c0_i32_0 = arith.constant 0 : i32
    return %arg0, %arg1, %c0_i32 : i32, i32, i32
  }
}

</mosaic_0001>

<bundles_post_ra>
// kernel: attn_like.1
= control target key start
LH: loop header
LB: loop body
LE: loop exit
PB: predicated region body
PF: predicated region fallthrough
CT: control target
= control target key end

     0   :  { %7 = vsyncpa [#allocation3], 0  ;;  %s730_s0 = inlined_call_operand.vmem [shape: f32[2,8,128], index: 0, kind: input, shape index: {}, may-alias: {0,1}]   ;;  %s731_s1 = inlined_call_operand.vmem [shape: f32[2,8,128], index: 1, kind: input, shape index: {}, may-alias: {0,1}]   ;;  %s732_s2 = inlined_call_operand.hbm [shape: f32[2,8,128], index: 2, kind: output, shape index: {}]  }
   0x1   :  { %9 = vsyncpa [#allocation3 + $0x1], 0  ;;  %s622_s9 = smov 0   ;;  %s624_s10 = smov 0  }
   0x2   :  { %s626_s11 = smov 0   ;;  %s628_s12 = smov 0  }
   0x3   :  { %s630_s13 = smov 0   ;;  %s632_s14 = smov 0  }
   0x4 LB: > { %s438_s15 = sadd.s32 4294967295, %s602_s14   ;;  %s439_s16 = sadd.s32 4294967294, %s602_s14   ;;  %s602_s14 = sphi %s632_s14, %s15_s14   ;;  %s598_s13 = sphi %s630_s13, %s739_s13   ;;  %s594_s12 = sphi %s628_s12, %s738_s12   ;;  %s590_s11 = sphi %s626_s11, %s737_s11   ;;  %s586_s10 = sphi %s624_s10, %s736_s10   ;;  %s582_s9 = sphi %s622_s9, %s735_s9  }
   0x5   : > { %s27_s17 = sadd.s32 1, %s598_s13  ;;  %s90_s18 = sadd.s32 1, %s590_s11 }
   0x6   : > { %p29_p0 = scmp.ge.s32.totalorder %s27_s17, 2  ;;  %p100_p1 = scmp.ne.s32.totalorder %s590_s11, %s586_s10 }
   0x7   : > { %p101_p2 = scmp.eq.s32.totalorder %s438_s15, 1  ;;  %p106_p3 = scmp.ne.s32.totalorder %s586_s10, %s582_s9 }
   0x8   : > { %s741_s17 = smov (%p29_p0, %s27_s17), 0  ;;  %p107_p5 = scmp.eq.s32.totalorder %s439_s16, 1 }
   0x9   : > { %p662_p4 = por %p101_p2, %p100_p1  ;;  %s85_s20 = ssub.s32 %s598_s13, %s741_s17 }
   0xa   : > { %p442_p6 = scmp.ge.s32.totalorder %s602_s14, 1  ;;  %p88_p7 = scmp.eq.s32.totalorder %s85_s20, 0 }
   0xb   : > { %p669_p8 = por %p107_p5, %p106_p3  ;;  %p142_p9 = scmp.lt.s32.totalorder %s602_s14, 3 }
   0xc   : > { %s675_s22 = scalar_select %p88_p7, %s590_s11, %s90_s18  }
   0xd   : > { %p143_p10 = pnand %p442_p6, %p142_p9 }
   0xe   : > { %p170_p11 = scmp.lt.s32.totalorder (!%p143_p10), %s594_s12, 1  ;;  %s167_s3 = sand.u32 (!%p143_p10), 1, %s586_s10  }
   0xf   : > { %146 = sbr.rel (%p143_p10) target bundleno = 587 (0x24b), region = 28  ;;  %s443_s4 = sshll.u32 (!%p143_p10), %s167_s3, 3 }
  0x10   : > { %s448_s5 = sshll.u32 (!%p143_p10), %s594_s12, 7  ;;  %s169_s6 = scalar_lea.vmem (!%p143_p10), [#allocation2], %s443_s4 }
  0x11   : > { %s355_s7 = sshll.u32 (!%p143_p10), %s169_s6, 4  ;;  %s690_s16 = scalar_lea.hbm (!%p143_p10), %s732_s2, %s448_s5  ;;  %s356_s7 = int_to_ptr.vmem [resolvable:$true] %s355_s7 }
  0x12   : > { %s341_s18 = scalar_lea.sflag (!%p143_p10), [#allocation3], %s167_s3  ;;  %s526_s20 = scalar_lea.vmem (!%p143_p10), %s356_s7, 128 }
  0x13   : > { %p527_p12 = scmp.ne.s32.totalorder (!%p143_p10), %s356_s7, %s526_s20 }
  0x14   : > { %v604_v0 = vmov 0.0   ;;  %vm605_vm0 = vmmov 0   ;;  %s171_s23 = scalar_select %p170_p11, %s594_s12, 1  ;;  %vm254_vm1 = vcmask 64512  }
  0x15   : > { %455 = vmatprep.subr.mxu0 %v604_v0  ;;  %457 = vmatprep.mubr.msk.f32.mxu0 %vm605_vm0, %v604_v0  ;;  %p528_p13 = pnand %p527_p12, %p662_p4  ;;  %s606_s12 = smov [#allocation2]  }
  0x16   : > { %460 = vmatprep.subr.mxu1 %v604_v0  ;;  %462 = vmatprep.mubr.msk.f32.mxu1 %vm605_vm0, %v604_v0  ;;  %s444_s24 = sshll.u32 %s171_s23, 3  ;;  %s530_s23 = sshll.u32 %s606_s12, 4  ;;  %s531_s23 = int_to_ptr.vmem [resolvable:$false] %s530_s23 }
  0x17   : > { %s176_s27 = scalar_lea.vmem %s730_s0, %s444_s24  ;;  %s180_s30 = scalar_lea.vmem %s731_s1, %s444_s24 }
  0x18   : > { %v181_v1 = vld [vmem:[%s176_s27] sm:$0xff]  ;;  %p529_p0 = pneg %p528_p13  ;;  %s532_s24 = scalar_lea.vmem %s531_s23, 256 }
  0x19   : > { %v182_v2 = vld [vmem:[%s180_s30] sm:$0xff]  ;;  %v183_v3 = vmul.f32 0.02, %v181_v1  ;;  %p533_p1 = scmp.lt.s32.totalorder %s356_s7, %s531_s23  ;;  %p534_p2 = scmp.lt.s32.totalorder %s532_s24, %s526_s20 }
  0x1a   : > { %456 = vmatpush3.xpose.msra.mxu0 %v182_v2  ;;  %461 = vmatpush3.msra.mxu1 %v182_v2 }
  0x1b   : > { %p535_p3 = por %p534_p2, %p533_p1 }
  0x1d   : > { %458 = vmatmul.mubr.f32.vlgmr.msra.gmra.mxu0 %v183_v3  ;;  %p536_p5 = pnand %p535_p3, %p529_p0 }
  0xdd   : > { %v250_v4 = vpop.f32.mrf.mxu0 }
  0xde   : > { %v255_v5 = vsel %vm254_vm1, %v250_v4, -inf }
  0xdf   : > { %256 = vmax.xlane.f32.xlu0 %v255_v5  ;;  %v459_v6 = vpop.f32.mrf.mxu0 }
 0x168   : > { %v257_v7 = vpop.xlane.xlu0 %256 }
 0x169   : > { %v258_v8 = vsub.f32 %v250_v4, %v257_v7 }
 0x16b   : > { %v259_v9 = vmul.f32 1.442695, %v258_v8 }
 0x16d   : > { %522 = vpow2.f32 %v259_v9 }
 0x17a   : > { %v523_v10 = vpop.eup %522 }
 0x17b   : > { %463 = vmatmul.mubr.msk.f32.vlgmr.msra.gmra.mxu1 %vm254_vm1, %v523_v10  ;;  %v261_v11 = vsel %vm254_vm1, %v523_v10, 0.0 }
 0x17c   : > { %262 = vadd.xlane.f32.xlu0 %v261_v11 }
 0x205   : > { %v263_v12 = vpop.xlane.xlu0 %262 }
 0x206   : > { %524 = vrcp.f32 %v263_v12 }
 0x213   : > { %v525_v13 = vpop.eup %524 }
 0x23b   : > { %v333_v14 = vpop.f32.mrf.mxu1 }
 0x23c   : > { %v338_v15 = vmul.f32 %v525_v13, %v333_v14 }
 0x23d   : > { %v464_v16 = vpop.f32.mrf.mxu1 }
 0x23e   : > { %339 = vst [vmem:[%s169_s6] sm:$0xff] %v338_v15 }
 0x23f   : > { %539 = shalt.err (!%p536_p5)
}
 0x240   : > { %s540_s25 = scalar_lea.hbm %s690_s16, 128  ;;  %s544_s28 = scalar_lea.hbm %s732_s2, 256 }
 0x241   : > { %p541_p6 = scmp.ne.s32.totalorder %s690_s16, %s540_s25  ;;  %p545_p10 = scmp.lt.s32.totalorder %s690_s16, %s732_s2 }
 0x242   : > { %p546_p11 = scmp.lt.s32.totalorder %s544_s28, %s540_s25 }
 0x243   : > { %p542_p7 = pnand %p541_p6, %p662_p4 }
 0x244   : > { %p547_p12 = por %p546_p11, %p545_p10 }
 0x245   : > { %p543_p9 = pneg %p542_p7 }
 0x247   : > { %p548_p13 = pnand %p547_p12, %p543_p9 }
 0x249   : > { %551 = shalt.err (!%p548_p13)
}
 0x24a   : > { %465 = dma.vmem_to_hbm [thread:$0]  (%p662_p4), %s356_s7, 128, %s690_s16, %s341_s18  }
 0x24b PF: > { %p471_p0 = scmp.ge.s32.totalorder %s602_s14, 2  ;;  %s367_s3 = sand.u32 1, %s582_s9  }
 0x24c   : > { %s368_s4 = scalar_lea.sflag [#allocation3], %s367_s3 }
 0x24d   : > { %p468_p1 = pnand %p471_p0, %p669_p8 }
 0x24f   : > { %p469_p2 = pneg %p468_p1 }
 0x251   : > { %577 = dma.done.wait (%p469_p2), %s368_s4, 128  }
 0x252   : > { %579 = vsyncadd (%p469_p2), %s368_s4, 4294967168  ;;  %s15_s14 = sadd.s32 1, %s602_s14   ;;  %s735_s9 = smov %s586_s10 }
 0x253   : > { %p12_p3 = scmp.ge.s32.totalorder %s15_s14, 4   ;;  %s736_s10 = smov %s590_s11 }
 0x254   : > { %s737_s11 = smov %s675_s22  ;;  %s738_s12 = smov %s598_s13 }
 0x255   : > { %s739_s13 = smov %s741_s17  ;;  %14 = sbr.rel (!%p12_p3) target bundleno = 4 (0x4), region = 66 }
 0x25a   :  { %373 = vsyncpa [#allocation3], 1 }
 0x25b   :  { %375 = vsyncpa [#allocation3 + $0x1], 1 }

</bundles_post_ra>
